<compile_context>
chip_gen: v5e
topology: v5e:2x2
jax: 0.10.0
libtpu: 0.0.40
codegen_flags: <defaults>
</compile_context>

<pallas_src>
from typing import Dict, List, Optional

import jax
import jax.numpy as jnp
from jax.experimental import pallas as pl
from jax.experimental.pallas import tpu as pltpu


_LANE = 128
_SUBLANE = 8
_MAX_TILE_ROWS = 512  # 512 rows * 128 lanes * 4 B = 256 KiB per loss per tile


# ----------------------------------------------------------------- kernels
def _mtl_naive_kernel(*refs):
    """refs = (loss_0, ..., loss_{L-1}, out); each a (tile_r, 128) VMEM tile.

    Elementwise sum over losses as an unrolled chain of VPU adds.
    """
    loss_refs, out_ref = refs[:-1], refs[-1]
    acc = loss_refs[0][...].astype(jnp.float32)
    for r in loss_refs[1:]:
        acc = acc + r[...].astype(jnp.float32)
    out_ref[...] = acc.astype(out_ref.dtype)


def _mtl_weighted_kernel(w_ref, *refs):
    """w_ref: (L,) f32 per-loss weights in SMEM (already scaled by `slice`).

    refs = (loss_0, ..., loss_{L-1}, out); each a (tile_r, 128) VMEM tile.
    Weighted elementwise sum as an unrolled chain of scalar-broadcast VPU FMAs.
    """
    loss_refs, out_ref = refs[:-1], refs[-1]
    acc = loss_refs[0][...].astype(jnp.float32) * w_ref[0]
    for l in range(1, len(loss_refs)):
        acc = acc + loss_refs[l][...].astype(jnp.float32) * w_ref[l]
    out_ref[...] = acc.astype(out_ref.dtype)


# ---------------------------------------------------------------- launcher
def _choose_tile_rows(n_elems: int, num_losses: int) -> int:
    """Rows per grid step: multiple of 8, <= 512, and double-buffered f32
    input footprint capped at ~8 MiB so it fits every chip's scoped VMEM."""
    rows_needed = -(-n_elems // _LANE)
    rows_needed = -(-rows_needed // _SUBLANE) * _SUBLANE
    cap = (8 * 1024 * 1024) // (num_losses * _LANE * 4 * 2)
    cap = max(_SUBLANE, (cap // _SUBLANE) * _SUBLANE)
    return max(_SUBLANE, min(_MAX_TILE_ROWS, rows_needed, cap))


def _mtl_pallas(loss_list, weights: Optional[jnp.ndarray] = None):
    """Elementwise (weighted) sum of same-shape loss tensors via one Pallas kernel.

    weights: optional (L,) f32 per-loss weights (already including the *slice
    factor).  None -> plain sum.  Output keeps the input dtype and shape.
    """
    shape = loss_list[0].shape
    dtype = loss_list[0].dtype
    num_losses = len(loss_list)

    flat = [x.reshape(-1) for x in loss_list]
    n = flat[0].shape[0]

    tile_r = _choose_tile_rows(n, num_losses)
    chunk = tile_r * _LANE
    n_pad = -(-n // chunk) * chunk
    if n_pad != n:
        # pad so every grid block is full and (8,128)-aligned
        flat = [jnp.pad(x, (0, n_pad - n)) for x in flat]
    rows = n_pad // _LANE
    tiles2d = [x.reshape(rows, _LANE) for x in flat]

    grid = (rows // tile_r,)
    loss_spec = pl.BlockSpec((tile_r, _LANE), lambda i: (i, 0))
    out_spec = pl.BlockSpec((tile_r, _LANE), lambda i: (i, 0))

    if weights is None:
        kernel = _mtl_naive_kernel
        in_specs = [loss_spec] * num_losses
        args = tiles2d
    else:
        kernel = _mtl_weighted_kernel
        in_specs = [pl.BlockSpec(memory_space=pltpu.MemorySpace.SMEM)] + (
            [loss_spec] * num_losses
        )
        args = [weights.astype(jnp.float32)] + tiles2d

    out = pl.pallas_call(
        kernel,
        out_shape=jax.ShapeDtypeStruct((rows, _LANE), dtype),
        grid=grid,
        in_specs=in_specs,
        out_specs=out_spec,
        compiler_params=pltpu.CompilerParams(
            dimension_semantics=("parallel",),
            vmem_limit_bytes=32 * 1024 * 1024,
        ),
    )(*args)

    out_flat = out.reshape(-1)
    if n_pad != n:
        out_flat = out_flat[:n]
    return out_flat.reshape(shape)


# ------------------------------------------------------------------ module
class MTL:
    """JAX/Pallas re-implementation of cflearn.modules.blocks.common.MTL."""

    def __init__(self, num_tasks: int, method: Optional[str] = None):
        self._n_task, self._method = num_tasks, method
        if method is None or method == "naive":
            self.w = None
        elif method == "softmax":
            self.w = jnp.ones((num_tasks,), jnp.float32)  # torch.ones(num_tasks)
        else:
            raise NotImplementedError(f"MTL method '{method}' not implemented")
        self.registered = False
        self._slice: Optional[int] = None
        self._registered: Dict[str, int] = {}

    def register(self, names: List[str]) -> None:
        if self.registered:
            raise ValueError("re-register is not permitted")
        self._rev_registered = {}
        for name in sorted(names):
            idx = len(self._registered)
            self._registered[name], self._rev_registered[idx] = idx, name
        self._slice, self.registered = len(names), True
        if self._slice > self._n_task:
            raise ValueError("registered names are more than n_task")

    # --------------------------------------------------------------- forward
    def __call__(self, loss_dict: Dict[str, jnp.ndarray], naive: bool = False):
        if not self.registered:
            raise ValueError("losses need to be registered")
        if naive or self._method is None:
            return self._naive(loss_dict)
        return getattr(self, f"_{self._method}")(loss_dict)

    def _naive(self, loss_dict):
        return _mtl_pallas(list(loss_dict.values()), weights=None)

    def _softmax(self, loss_dict):
        assert self._slice is not None
        t = self._slice
        w = self.w if t == self._n_task else self.w[: t]
        # softmax over the (tiny) task-weight vector: O(T) wrapper-side scalars
        m = jnp.max(w)
        e = jnp.exp(w - m)
        sw = e / jnp.sum(e)
        keys = list(loss_dict.keys())
        per_loss = []
        for k in keys:
            idx = self._registered.get(k)
            per_loss.append(jnp.float32(1.0) if idx is None else sw[idx])
        eff_w = jnp.stack(per_loss) * jnp.float32(t)  # (L,) incl. *slice scaling
        return _mtl_pallas([loss_dict[k] for k in keys], weights=eff_w)


# -------------------------------------------------------------------- demo
if __name__ == "__main__":
    key = jax.random.PRNGKey(0)
    k1, k2, k3, k4 = jax.random.split(key, 4)

    num_tasks = 3
    loss_shape = (2, 64)  # small per-sample losses
    loss_dict = {
        "a": jax.random.uniform(k1, loss_shape, jnp.float32),
        "b": jax.random.uniform(k2, loss_shape, jnp.float32),
        "c": jax.random.uniform(k3, loss_shape, jnp.float32),
        "extra": jax.random.uniform(k4, loss_shape, jnp.float32),  # unregistered
    }

    # softmax method
    mtl = MTL(num_tasks, method="softmax")
    mtl.register(["a", "b", "c"])
    out = jax.block_until_ready(mtl(loss_dict))

    # plain-JAX reference of the torch semantics
    sw_ref = jax.nn.softmax(mtl.w[: mtl._slice])
    ref = sum(
        loss_dict[k]
        * (sw_ref[mtl._registered[k]] if k in mtl._registered else 1.0)
        for k in loss_dict
    ) * mtl._slice
    assert out.shape == ref.shape and out.dtype == jnp.float32
    assert jnp.allclose(out, ref, atol=1e-5, rtol=1e-5), "softmax path mismatch"

    # naive method
    mtl_naive = MTL(num_tasks, method=None)
    mtl_naive.register(["a", "b", "c"])
    out_naive = jax.block_until_ready(mtl_naive(loss_dict))
    ref_naive = sum(loss_dict.values())
    assert jnp.allclose(out_naive, ref_naive, atol=1e-5, rtol=1e-5), "naive path mismatch"

    print("KERNEL_OK")
</pallas_src>

<mosaic_0001>
module attributes {stable_mosaic.version = 11 : i64} {
  func.func @_mtl_weighted_kernel(%arg0: i32, %arg1: memref<4xf32, #tpu.memory_space<smem>>, %arg2: memref<8x128xf32, #tpu.memory_space<vmem>>, %arg3: memref<8x128xf32, #tpu.memory_space<vmem>>, %arg4: memref<8x128xf32, #tpu.memory_space<vmem>>, %arg5: memref<8x128xf32, #tpu.memory_space<vmem>>, %arg6: memref<8x128xf32, #tpu.memory_space<vmem>>) attributes {dimension_semantics = [#tpu.dimension_semantics<parallel>], iteration_bounds = array<i64: 1>, scalar_prefetch = 0 : i64, scratch_operands = 0 : i64, tpu.core_type = #tpu.core_type<tc>, window_params = [{transform_indices = @transform_0, window_bounds = array<i64: 4>}, {transform_indices = @transform_1, window_bounds = array<i64: 8, 128>}, {transform_indices = @transform_2, window_bounds = array<i64: 8, 128>}, {transform_indices = @transform_3, window_bounds = array<i64: 8, 128>}, {transform_indices = @transform_4, window_bounds = array<i64: 8, 128>}, {transform_indices = @transform_5, window_bounds = array<i64: 8, 128>}]} {
    %c0 = arith.constant 0 : index
    %c0_0 = arith.constant 0 : index
    %0 = vector.load %arg2[%c0, %c0_0] : memref<8x128xf32, #tpu.memory_space<vmem>>, vector<8x128xf32>
    %c0_1 = arith.constant 0 : index
    %1 = memref.load %arg1[%c0_1] : memref<4xf32, #tpu.memory_space<smem>>
    %2 = vector.broadcast %1 : f32 to vector<8x128xf32>
    %3 = arith.mulf %0, %2 : vector<8x128xf32>
    %c0_2 = arith.constant 0 : index
    %c0_3 = arith.constant 0 : index
    %4 = vector.load %arg3[%c0_2, %c0_3] : memref<8x128xf32, #tpu.memory_space<vmem>>, vector<8x128xf32>
    %c1 = arith.constant 1 : index
    %5 = memref.load %arg1[%c1] : memref<4xf32, #tpu.memory_space<smem>>
    %6 = vector.broadcast %5 : f32 to vector<8x128xf32>
    %7 = arith.mulf %4, %6 : vector<8x128xf32>
    %8 = arith.addf %3, %7 : vector<8x128xf32>
    %c0_4 = arith.constant 0 : index
    %c0_5 = arith.constant 0 : index
    %9 = vector.load %arg4[%c0_4, %c0_5] : memref<8x128xf32, #tpu.memory_space<vmem>>, vector<8x128xf32>
    %c2 = arith.constant 2 : index
    %10 = memref.load %arg1[%c2] : memref<4xf32, #tpu.memory_space<smem>>
    %11 = vector.broadcast %10 : f32 to vector<8x128xf32>
    %12 = arith.mulf %9, %11 : vector<8x128xf32>
    %13 = arith.addf %8, %12 : vector<8x128xf32>
    %c0_6 = arith.constant 0 : index
    %c0_7 = arith.constant 0 : index
    %14 = vector.load %arg5[%c0_6, %c0_7] : memref<8x128xf32, #tpu.memory_space<vmem>>, vector<8x128xf32>
    %c3 = arith.constant 3 : index
    %15 = memref.load %arg1[%c3] : memref<4xf32, #tpu.memory_space<smem>>
    %16 = vector.broadcast %15 : f32 to vector<8x128xf32>
    %17 = arith.mulf %14, %16 : vector<8x128xf32>
    %18 = arith.addf %13, %17 : vector<8x128xf32>
    %c0_8 = arith.constant 0 : index
    %c0_9 = arith.constant 0 : index
    %19 = vector.load %arg6[%c0_8, %c0_9] : memref<8x128xf32, #tpu.memory_space<vmem>>, vector<8x128xf32>
    tpu.vector_store %arg6[%c0_8, %c0_9], %18 {strides = array<i32>} : memref<8x128xf32, #tpu.memory_space<vmem>>, vector<8x128xf32>,
    return
  }
  func.func @transform_0(%arg0: i32) -> i32 {
    %c0_i32 = arith.constant 0 : i32
    %c0_i32_0 = arith.constant 0 : i32
    return %c0_i32 : i32
  }
  func.func @transform_1(%arg0: i32) -> (i32, i32) {
    %c0_i32 = arith.constant 0 : i32
    %c0_i32_0 = arith.constant 0 : i32
    return %arg0, %c0_i32 : i32, i32
  }
  func.func @transform_2(%arg0: i32) -> (i32, i32) {
    %c0_i32 = arith.constant 0 : i32
    %c0_i32_0 = arith.constant 0 : i32
    return %arg0, %c0_i32 : i32, i32
  }
  func.func @transform_3(%arg0: i32) -> (i32, i32) {
    %c0_i32 = arith.constant 0 : i32
    %c0_i32_0 = arith.constant 0 : i32
    return %arg0, %c0_i32 : i32, i32
  }
  func.func @transform_4(%arg0: i32) -> (i32, i32) {
    %c0_i32 = arith.constant 0 : i32
    %c0_i32_0 = arith.constant 0 : i32
    return %arg0, %c0_i32 : i32, i32
  }
  func.func @transform_5(%arg0: i32) -> (i32, i32) {
    %c0_i32 = arith.constant 0 : i32
    %c0_i32_0 = arith.constant 0 : i32
    return %arg0, %c0_i32 : i32, i32
  }
}

</mosaic_0001>

<bundles_post_ra>
// kernel: tpu_custom_call.1
= control target key start
LH: loop header
LB: loop body
LE: loop exit
PB: predicated region body
PF: predicated region fallthrough
CT: control target
= control target key end

     0   :  { %10 = vsyncpa [#allocation5], 0  ;;  %s334_s0 = inlined_call_operand.hbm [shape: f32[4], index: 0, kind: input, shape index: {}]   ;;  %s335_s1 = inlined_call_operand.hbm [shape: f32[8,128], index: 1, kind: input, shape index: {}]   ;;  %s336_s2 = inlined_call_operand.hbm [shape: f32[8,128], index: 2, kind: input, shape index: {}]   ;;  %s337_s3 = inlined_call_operand.hbm [shape: f32[8,128], index: 3, kind: input, shape index: {}]   ;;  %s338_s4 = inlined_call_operand.hbm [shape: f32[8,128], index: 4, kind: input, shape index: {}]   ;;  %s339_s5 = inlined_call_operand.hbm [shape: f32[8,128], index: 5, kind: output, shape index: {}]  }
   0x1   :  { %11 = vsyncpa [#allocation3], 0 }
   0x2   :  { %12 = vsyncpa [#allocation8], 0 }
   0x3   :  { %13 = vsyncpa [#allocation11], 0  ;;  %s40_s20 = sshll.u32 %s336_s2, 4  ;;  %s41_s20 = int_to_ptr.hbm [resolvable:$true] %s40_s20 }
   0x4   :  { %14 = vsyncpa [#allocation4], 0  ;;  %s280_s21 = smov [#allocation7]   ;;  %s20_s25 = sshll.u32 %s334_s0, 4  ;;  %s21_s25 = int_to_ptr.hbm [resolvable:$true] %s20_s25 }
   0x5   :  { %s42_s22 = sshll.u32 %s280_s21, 4  ;;  %s281_s26 = smov [#allocation2]   ;;  %s43_s22 = int_to_ptr.vmem [resolvable:$true] %s42_s22 }
   0x6   :  { %45 = dma.hbm_to_vmem [thread:$0]  %s41_s20, 128, %s43_s22, [#allocation8]  }
   0x7   :  { %23 = dma.hbm_to_smem %s21_s25, 16, %s281_s26, [#allocation5]  }
   0x8   :  { %s29_s29 = sshll.u32 %s335_s1, 4  ;;  %s282_s30 = smov [#allocation6]   ;;  %s30_s29 = int_to_ptr.hbm [resolvable:$true] %s29_s29 }
   0x9   :  { %s31_s2 = sshll.u32 %s282_s30, 4  ;;  %s51_s8 = sshll.u32 %s337_s3, 4  ;;  %s32_s2 = int_to_ptr.vmem [resolvable:$true] %s31_s2  ;;  %s52_s8 = int_to_ptr.hbm [resolvable:$true] %s51_s8 }
   0xa   :  { %34 = dma.hbm_to_vmem [thread:$0]  %s30_s29, 128, %s32_s2, [#allocation3]  }
   0xb   :  { %s283_s9 = smov [#allocation9]   ;;  %s62_s12 = sshll.u32 %s338_s4, 4  ;;  %s63_s12 = int_to_ptr.hbm [resolvable:$true] %s62_s12 }
   0xc   :  { %s53_s0 = sshll.u32 %s283_s9, 4  ;;  %s284_s1 = smov [#allocation10]   ;;  %s54_s0 = int_to_ptr.vmem [resolvable:$true] %s53_s0 }
   0xd   :  { %56 = dma.hbm_to_vmem [thread:$0]  %s52_s8, 128, %s54_s0, [#allocation8]  }
   0xe   :  { %s64_s13 = sshll.u32 %s284_s1, 4  ;;  %s65_s13 = int_to_ptr.vmem [resolvable:$true] %s64_s13 }
   0xf   :  { %67 = dma.hbm_to_vmem [thread:$0]  %s63_s12, 128, %s65_s13, [#allocation11]  }
  0x10   :  { %270 = dma.done.wait [#allocation5], 16  }
  0x11   :  { %271 = vsyncadd [#allocation5], 4294967280 }
  0x12   :  { %272 = dma.done.wait [#allocation3], 128  }
  0x13   :  { %273 = vsyncadd [#allocation3], 4294967168 }
  0x14   :  { %274 = dma.done.wait [#allocation8], 256  }
  0x15   :  { %275 = vsyncadd [#allocation8], 4294967040 }
  0x16   :  { %276 = dma.done.wait [#allocation11], 128  }
  0x17   :  { %277 = vsyncadd [#allocation11], 4294967168 }
  0x18   :  { %88 = sfence }
  0x19   :  { %s90_s3 = sld [smem:[#allocation2]]  ;;  %v89_v0 = vld [vmem:[#allocation6] sm:$0xff]  ;;  %v93_v1 = vld [vmem:[#allocation7] sm:$0xff]  ;;  %v98_v3 = vld [vmem:[#allocation9] sm:$0xff]  ;;  %s285_s16 = smov [#allocation12]  }
  0x1a   :  { %s129_s14 = sld [smem:[#allocation2 + $0x1]]  ;;  %v103_v6 = vld [vmem:[#allocation10] sm:$0xff]  ;;  %s114_s17 = sshll.u32 %s285_s16, 4  ;;  %s115_s17 = int_to_ptr.vmem [resolvable:$true] %s114_s17 }
  0x1b   :  { %s130_s15 = sld [smem:[#allocation2 + $0x2]]  ;;  %s116_s20 = sshll.u32 %s339_s5, 4  ;;  %s117_s20 = int_to_ptr.hbm [resolvable:$true] %s116_s20 }
  0x1c   :  { %s131_s4 = sld [smem:[#allocation2 + $0x3]] }
  0x1f   :  { %v91_v2 = vstv %s90_s3 }
  0x20   :  { %v92_v4 = vmul.f32 %v91_v2, %v89_v0  ;;  %v95_v5 = vstv %s129_s14 }
  0x21   :  { %v96_v7 = vmul.f32 %v95_v5, %v93_v1  ;;  %v100_v8 = vstv %s130_s15 }
  0x22   :  { %v101_v9 = vmul.f32 %v100_v8, %v98_v3  ;;  %v105_v10 = vstv %s131_s4 }
  0x23   :  { %v97_v11 = vadd.f32 %v96_v7, %v92_v4  ;;  %v106_v12 = vmul.f32 %v105_v10, %v103_v6 }
  0x25   :  { %v102_v13 = vadd.f32 %v101_v9, %v97_v11 }
  0x27   :  { %v107_v14 = vadd.f32 %v106_v12, %v102_v13 }
  0x29   :  { %108 = vst [vmem:[#allocation12] sm:$0xff] %v107_v14 }
  0x2a   :  { %119 = dma.vmem_to_hbm [thread:$0]  %s115_s17, 128, %s117_s20, [#allocation4]  }
  0x2b   :  { %278 = dma.done.wait [#allocation4], 128  }
  0x2c   :  { %279 = vsyncadd [#allocation4], 4294967168 }
  0x2d   :  { %124 = vsyncpa [#allocation3], 1 }
  0x2e   :  { %125 = vsyncpa [#allocation8], 1 }
  0x2f   :  { %126 = vsyncpa [#allocation11], 1 }
  0x30   :  { %127 = vsyncpa [#allocation4], 1 }
  0x31   :  { %128 = vsyncpa [#allocation5], 1 }

</bundles_post_ra>
